<compile_context>
chip_gen: v7x
topology: tpu7x:2x2x1
jax: 0.10.0
libtpu: 0.0.40
codegen_flags: <defaults>
</compile_context>

<pallas_src>
import functools

import jax
import jax.numpy as jnp
from jax import lax
from jax.experimental import pallas as pl
from jax.experimental.pallas import tpu as pltpu

EPSILON = 5.0


def _round_up(x, m):
    return ((x + m - 1) // m) * m


def _cdiv(a, b):
    return (a + b - 1) // b


def _choose_tile_rows(B, D, C, *, target_tile_bytes=2 << 20, vmem_budget=36 << 20):
    """Pick feature-tile rows: ~target_tile_bytes per tile, VMEM-budget capped."""
    row_bytes = D * 4
    tb = _round_up(max(target_tile_bytes // row_bytes, 1), 8)

    # Budget: 2x feature tile (double buffered) + 2x labels tile (lane padded)
    #         + 2x resident means + slack  <= vmem_budget.
    means_bytes = 2 * _round_up(C, 8) * _round_up(D, 128) * 4
    labels_bytes_per_row = 128 * 4          # (tb, 1) int32 pads to a full lane row
    misc = 1 << 20
    avail = vmem_budget - means_bytes - misc
    denom = 2 * row_bytes + 2 * labels_bytes_per_row
    max_tb = max((max(avail, 0) // denom) // 8 * 8, 8)

    tb = min(tb, max_tb)
    tb = min(tb, _round_up(B, 8))           # never bigger than the (rounded) batch
    return max(tb, 8)


def _nc_loss_kernel(labels_ref, feat_ref, means_ref, out_ref, acc_ref, *,
                    epsilon, batch, tile_rows, tiles_per_core):
    # labels_ref: VMEM [TB, 1] int32  -- labels for this tile
    # feat_ref:   VMEM [TB, D]        -- feature rows for this tile
    # means_ref:  VMEM [C, D]         -- full class-mean table (resident)
    # out_ref:    VMEM [8, 128] f32   -- per-core-split partial-sum block
    # acc_ref:    VMEM [1, 1]  f32    -- running partial sum (scratch)
    c = pl.program_id(0)   # core-split axis ("parallel", extent 1 by default)
    j = pl.program_id(1)   # reduction axis over feature tiles ("arbitrary")

    @pl.when(j == 0)
    def _():
        acc_ref[...] = jnp.zeros_like(acc_ref)

    labels = labels_ref[...]                               # [TB, 1] int32
    feats = feat_ref[...].astype(jnp.float32)              # [TB, D]
    means = means_ref[...].astype(jnp.float32)             # [C, D]
    num_classes = means.shape[0]

    # Gather per-row class means via one-hot matmul on the MXU (exact in f32).
    class_ids = lax.broadcasted_iota(jnp.int32, (tile_rows, num_classes), 1)
    one_hot = (labels == class_ids).astype(jnp.float32)    # [TB, C]
    gathered = jnp.dot(one_hot, means,
                       preferred_element_type=jnp.float32)  # [TB, D]

    # Vectorized L2 distance + hinge for the whole tile.
    diff = feats - gathered
    d2 = jnp.sum(diff * diff, axis=-1, keepdims=True)      # [TB, 1]
    dist = jnp.sqrt(d2)
    hinge = jnp.maximum(epsilon - dist, 0.0)                # [TB, 1]

    # Select-mask rows beyond the true batch (ragged last tile, OOB reads).
    tile_idx = c * tiles_per_core + j
    row = tile_idx * tile_rows + lax.broadcasted_iota(jnp.int32, (tile_rows, 1), 0)
    hinge = jnp.where(row < batch, hinge, 0.0)

    acc_ref[...] = acc_ref[...] + jnp.sum(hinge)

    @pl.when(j == tiles_per_core - 1)
    def _():
        out_ref[...] = jnp.broadcast_to(acc_ref[...], out_ref.shape)


def neural_collapse_loss(features, target_means, target_labels,
                         epsilon=EPSILON, core_splits=1):
    """features: [B, D], target_means: [C, D], target_labels: [B] int -> scalar f32."""
    B, D = features.shape
    C, _ = target_means.shape
    nc = max(int(core_splits), 1)

    tb = _choose_tile_rows(B, D, C)
    n_tiles = _cdiv(B, tb)
    tiles_per_core = _cdiv(n_tiles, nc)

    labels2d = target_labels.astype(jnp.int32).reshape(B, 1)

    kernel = functools.partial(
        _nc_loss_kernel,
        epsilon=float(epsilon),
        batch=int(B),
        tile_rows=int(tb),
        tiles_per_core=int(tiles_per_core),
    )

    # Explicit VMEM budget (raises v5e's 16 MiB scoped default, stays well
    # under v7x's 64 MiB physical per-TC VMEM).
    feat_tile_bytes = tb * D * 4
    label_tile_bytes = tb * 128 * 4
    means_bytes = _round_up(C, 8) * _round_up(D, 128) * 4
    needed = (2 * feat_tile_bytes + 2 * label_tile_bytes + 2 * means_bytes
              + 2 * nc * 8 * 128 * 4 + (1 << 20))
    vmem_limit = int(min(max(needed + (8 << 20), 32 << 20), 60 << 20))

    out = pl.pallas_call(
        kernel,
        out_shape=jax.ShapeDtypeStruct((nc * 8, 128), jnp.float32),
        grid_spec=pltpu.PrefetchScalarGridSpec(
            num_scalar_prefetch=0,
            grid=(nc, tiles_per_core),
            in_specs=[
                pl.BlockSpec((tb, 1), lambda c, j: (c * tiles_per_core + j, 0)),
                pl.BlockSpec((tb, D), lambda c, j: (c * tiles_per_core + j, 0)),
                pl.BlockSpec((C, D), lambda c, j: (0, 0)),  # means: VMEM-resident
            ],
            out_specs=pl.BlockSpec((8, 128), lambda c, j: (c, 0)),
            scratch_shapes=[pltpu.VMEM((1, 1), jnp.float32)],
        ),
        compiler_params=pltpu.CompilerParams(
            dimension_semantics=("parallel", "arbitrary"),
            vmem_limit_bytes=vmem_limit,
        ),
    )(labels2d, features, target_means)

    partial_sums = out[::8, 0]          # one partial sum per core split
    return jnp.sum(partial_sums) / B


def _reference(features, target_means, target_labels, epsilon=EPSILON):
    means = target_means[target_labels]                       # [B, D]
    dist = jnp.sqrt(jnp.sum((features - means) ** 2, axis=-1))
    return jnp.mean(jnp.maximum(epsilon - dist, 0.0))


if __name__ == "__main__":
    key = jax.random.PRNGKey(0)
    k1, k2, k3, k4, k5, k6 = jax.random.split(key, 6)

    # Test 1: module-default epsilon, small batch.
    B, C, D = 8, 4, 128
    features = jax.random.normal(k1, (B, D), dtype=jnp.float32)
    target_means = jax.random.normal(k2, (C, D), dtype=jnp.float32)
    target_labels = jax.random.randint(k3, (B,), 0, C, dtype=jnp.int32)

    loss = neural_collapse_loss(features, target_means, target_labels)
    loss = jax.block_until_ready(loss)
    ref = _reference(features, target_means, target_labels)
    assert jnp.allclose(loss, ref, rtol=1e-5, atol=1e-5), (loss, ref)

    # Test 2: non-multiple-of-8 batch (exercises the ragged-last-tile mask,
    # no wrapper-side padding) + large epsilon so hinges are nonzero.
    B2, C2, D2 = 20, 4, 128
    features2 = jax.random.normal(k4, (B2, D2), dtype=jnp.float32)
    target_means2 = jax.random.normal(k5, (C2, D2), dtype=jnp.float32)
    target_labels2 = jax.random.randint(k6, (B2,), 0, C2, dtype=jnp.int32)

    loss2 = neural_collapse_loss(features2, target_means2, target_labels2, epsilon=20.0)
    loss2 = jax.block_until_ready(loss2)
    ref2 = _reference(features2, target_means2, target_labels2, epsilon=20.0)
    assert jnp.allclose(loss2, ref2, rtol=1e-5, atol=1e-5), (loss2, ref2)

    print("KERNEL_OK")
</pallas_src>

<mosaic_0001>
module attributes {stable_mosaic.version = 11 : i64} {
  func.func @_nc_loss_kernel(%arg0: i32, %arg1: i32, %arg2: memref<8x1xi32, #tpu.memory_space<vmem>>, %arg3: memref<8x128xf32, #tpu.memory_space<vmem>>, %arg4: memref<4x128xf32, #tpu.memory_space<vmem>>, %arg5: memref<8x128xf32, #tpu.memory_space<vmem>>, %arg6: memref<1x1xf32, #tpu.memory_space<vmem>>) attributes {dimension_semantics = [#tpu.dimension_semantics<parallel>, #tpu.dimension_semantics<arbitrary>], iteration_bounds = array<i64: 1, 1>, scalar_prefetch = 0 : i64, scratch_operands = 1 : i64, tpu.core_type = #tpu.core_type<tc>, window_params = [{transform_indices = @transform_0, window_bounds = array<i64: 8, 1>}, {transform_indices = @transform_1, window_bounds = array<i64: 8, 128>}, {pipeline_mode = #tpu.pipeline_mode<synchronous>, transform_indices = @transform_2, window_bounds = array<i64: 4, 128>}, {transform_indices = @transform_3, window_bounds = array<i64: 8, 128>}]} {
    %c0_i32 = arith.constant 0 : i32
    %0 = arith.cmpi eq, %arg1, %c0_i32 : i32
    %1 = arith.extui %0 : i1 to i32
    %c0_i32_0 = arith.constant 0 : i32
    %2 = arith.cmpi ne, %1, %c0_i32_0 : i32
    scf.if %2 {
      %cst_18 = arith.constant 0.000000e+00 : f32
      %42 = vector.broadcast %cst_18 : f32 to vector<1x1xf32>
      %c0_19 = arith.constant 0 : index
      %c0_20 = arith.constant 0 : index
      %43 = vector.load %arg6[%c0_19, %c0_20] : memref<1x1xf32, #tpu.memory_space<vmem>>, vector<1x1xf32>
      tpu.vector_store %arg6[%c0_19, %c0_20], %42 {strides = array<i32>} : memref<1x1xf32, #tpu.memory_space<vmem>>, vector<1x1xf32>,
    } else {
    }
    %c0 = arith.constant 0 : index
    %c0_1 = arith.constant 0 : index
    %3 = vector.load %arg2[%c0, %c0_1] : memref<8x1xi32, #tpu.memory_space<vmem>>, vector<8x1xi32>
    %c0_2 = arith.constant 0 : index
    %c0_3 = arith.constant 0 : index
    %4 = vector.load %arg3[%c0_2, %c0_3] : memref<8x128xf32, #tpu.memory_space<vmem>>, vector<8x128xf32>
    %c0_4 = arith.constant 0 : index
    %c0_5 = arith.constant 0 : index
    %5 = vector.load %arg4[%c0_4, %c0_5] : memref<4x128xf32, #tpu.memory_space<vmem>>, vector<4x128xf32>
    %6 = tpu.iota {dimensions = array<i32: 1>} : vector<8x4xi32>
    %7 = vector.broadcast %3 : vector<8x1xi32> to vector<8x4xi32>
    %8 = arith.cmpi eq, %7, %6 : vector<8x4xi32>
    %9 = arith.extui %8 : vector<8x4xi1> to vector<8x4xi32>
    %10 = arith.sitofp %9 : vector<8x4xi32> to vector<8x4xf32>
    %cst = arith.constant dense<0.000000e+00> : vector<8x128xf32>
    %11 = tpu.matmul %10, %5, %cst {dimension_numbers = #tpu.dot_dimension_numbers<[1], [0], [0], [1], [0, 0, 1, 1], [], []>} : vector<8x4xf32>, vector<4x128xf32>, vector<8x128xf32> -> vector<8x128xf32>
    %12 = arith.subf %4, %11 : vector<8x128xf32>
    %13 = arith.mulf %12, %12 : vector<8x128xf32>
    %cst_6 = arith.constant dense<0.000000e+00> : vector<8xf32>
    %14 = vector.multi_reduction <add>, %13, %cst_6 [1] : vector<8x128xf32> to vector<8xf32>
    %15 = vector.shape_cast %14 : vector<8xf32> to vector<8x1xf32>
    %16 = math.sqrt %15 : vector<8x1xf32>
    %cst_7 = arith.constant 5.000000e+00 : f32
    %17 = vector.broadcast %cst_7 : f32 to vector<8x1xf32>
    %18 = arith.subf %17, %16 : vector<8x1xf32>
    %cst_8 = arith.constant 0.000000e+00 : f32
    %19 = vector.broadcast %cst_8 : f32 to vector<8x1xf32>
    %20 = arith.maximumf %18, %19 : vector<8x1xf32>
    %c1_i32 = arith.constant 1 : i32
    %21 = arith.muli %arg0, %c1_i32 : i32
    %22 = arith.addi %21, %arg1 : i32
    %c8_i32 = arith.constant 8 : i32
    %23 = arith.muli %22, %c8_i32 : i32
    %24 = tpu.iota {dimensions = array<i32: 0>} : vector<8x1xi32>
    %25 = vector.broadcast %23 : i32 to vector<8x1xi32>
    %26 = arith.addi %25, %24 : vector<8x1xi32>
    %c8_i32_9 = arith.constant 8 : i32
    %27 = vector.broadcast %c8_i32_9 : i32 to vector<8x1xi32>
    %28 = arith.cmpi slt, %26, %27 : vector<8x1xi32>
    %cst_10 = arith.constant 0.000000e+00 : f32
    %29 = vector.broadcast %cst_10 : f32 to vector<8x1xf32>
    %30 = arith.select %28, %20, %29 : vector<8x1xi1>, vector<8x1xf32>
    %c0_11 = arith.constant 0 : index
    %c0_12 = arith.constant 0 : index
    %31 = vector.load %arg6[%c0_11, %c0_12] : memref<1x1xf32, #tpu.memory_space<vmem>>, vector<1x1xf32>
    %32 = vector.shape_cast %30 : vector<8x1xf32> to vector<1x8x1xf32>
    %cst_13 = arith.constant dense<0.000000e+00> : vector<1xf32>
    %33 = vector.multi_reduction <add>, %32, %cst_13 [1, 2] : vector<1x8x1xf32> to vector<1xf32>
    %34 = vector.shape_cast %33 : vector<1xf32> to vector<1x1x1xf32>
    %35 = vector.extract %34[0, 0, 0] : f32 from vector<1x1x1xf32>
    %36 = vector.broadcast %35 : f32 to vector<1x1xf32>
    %37 = arith.addf %31, %36 : vector<1x1xf32>
    %c0_14 = arith.constant 0 : index
    %c0_15 = arith.constant 0 : index
    %38 = vector.load %arg6[%c0_14, %c0_15] : memref<1x1xf32, #tpu.memory_space<vmem>>, vector<1x1xf32>
    tpu.vector_store %arg6[%c0_14, %c0_15], %37 {strides = array<i32>} : memref<1x1xf32, #tpu.memory_space<vmem>>, vector<1x1xf32>,
    %c0_i32_16 = arith.constant 0 : i32
    %39 = arith.cmpi eq, %arg1, %c0_i32_16 : i32
    %40 = arith.extui %39 : i1 to i32
    %c0_i32_17 = arith.constant 0 : i32
    %41 = arith.cmpi ne, %40, %c0_i32_17 : i32
    scf.if %41 {
      %c0_18 = arith.constant 0 : index
      %c0_19 = arith.constant 0 : index
      %42 = vector.load %arg6[%c0_18, %c0_19] : memref<1x1xf32, #tpu.memory_space<vmem>>, vector<1x1xf32>
      %43 = vector.shape_cast %42 : vector<1x1xf32> to vector<1x1xf32>
      %44 = vector.broadcast %43 : vector<1x1xf32> to vector<8x128xf32>
      %c0_20 = arith.constant 0 : index
      %c0_21 = arith.constant 0 : index
      %45 = vector.load %arg5[%c0_20, %c0_21] : memref<8x128xf32, #tpu.memory_space<vmem>>, vector<8x128xf32>
      tpu.vector_store %arg5[%c0_20, %c0_21], %44 {strides = array<i32>} : memref<8x128xf32, #tpu.memory_space<vmem>>, vector<8x128xf32>,
    } else {
    }
    return
  }
  func.func @transform_0(%arg0: i32, %arg1: i32) -> (i32, i32) {
    %c1_i32 = arith.constant 1 : i32
    %0 = arith.muli %arg0, %c1_i32 : i32
    %1 = arith.addi %0, %arg1 : i32
    %c0_i32 = arith.constant 0 : i32
    %c0_i32_0 = arith.constant 0 : i32
    return %1, %c0_i32 : i32, i32
  }
  func.func @transform_1(%arg0: i32, %arg1: i32) -> (i32, i32) {
    %c1_i32 = arith.constant 1 : i32
    %0 = arith.muli %arg0, %c1_i32 : i32
    %1 = arith.addi %0, %arg1 : i32
    %c0_i32 = arith.constant 0 : i32
    %c0_i32_0 = arith.constant 0 : i32
    return %1, %c0_i32 : i32, i32
  }
  func.func @transform_2(%arg0: i32, %arg1: i32) -> (i32, i32) {
    %c0_i32 = arith.constant 0 : i32
    %c0_i32_0 = arith.constant 0 : i32
    %c0_i32_1 = arith.constant 0 : i32
    return %c0_i32, %c0_i32_0 : i32, i32
  }
  func.func @transform_3(%arg0: i32, %arg1: i32) -> (i32, i32) {
    %c0_i32 = arith.constant 0 : i32
    %c0_i32_0 = arith.constant 0 : i32
    return %arg0, %c0_i32 : i32, i32
  }
}

</mosaic_0001>

<bundles_post_ra>
// kernel: tpu_custom_call.1
= control target key start
LH: loop header
LB: loop body
LE: loop exit
PB: predicated region body
PF: predicated region fallthrough
CT: control target
= control target key end

     0   :  { %s313_s0 = inlined_call_operand.vmem [shape: s32[8,1], index: 0, kind: input, shape index: {}]   ;;  %s314_s1 = inlined_call_operand.vmem [shape: f32[8,128], index: 1, kind: input, shape index: {}]   ;;  %s315_s2 = inlined_call_operand.vmem [shape: f32[4,128], index: 2, kind: input, shape index: {}]   ;;  %s316_s3 = inlined_call_operand.hbm [shape: f32[8,128], index: 3, kind: output, shape index: {}]  }
   0x1   :  { %v55_v0 = vld [vmem:[%s313_s0] sm:$0xff] }
   0x2   :  { %8 = vsyncpa [#allocation4], 0  ;;  %v266_v1 = vmov 0   ;;  %vm53_vm0 = vcmask 0   ;;  %v267_v2 = vmov 0.0   ;;  %vm70_vm1 = vcmask 1043456  }
   0x3   :  { %238 = vset.pattern.permute.xlu0 %v266_v1  ;;  %239 = vset.pattern.permute.xlu1 %v266_v1  ;;  %54 = vst.msk [vmem:[#allocation2] sm:$0x1] %vm53_vm0, %v267_v2  ;;  %v57_v3 = vld [vmem:[%s315_s2] sm:$0xf]  ;;  %vm268_vm2 = vmmov 0   ;;  %v58_v4 = vlaneseq  ;;  %vm66_vm3 = vcmask 31744  }
   0x4   :  { %61 = vperm.xlu0 %238, %v55_v0   ;;  %227 = vmatprep.subr.mxu0 %v267_v2  ;;  %v56_v8 = vld [vmem:[%s314_s1] sm:$0xff]  ;;  %vm166_vm7 = vcmask 7168   ;;  %s269_s2 = smov [#allocation3]  }
   0x5   :  { %228 = vmatpush3.msk.msra.mxu0 %vm70_vm1, %v57_v3  ;;  %229 = vmatprep.mubr.msk.f32.mxu0 %vm268_vm2, %v267_v2  ;;  %v59_v5 = vand.u32 127, %v58_v4  ;;  %s201_s17 = sshll.u32 %s269_s2, 4  ;;  %s202_s17 = int_to_ptr.vmem [resolvable:$true] %s201_s17 }
   0x6   :  { %s242_s18 = scalar_lea.vmem %s202_s17, 128  ;;  %p247_p1 = scmp.lt.s32.totalorder %s202_s17, %s202_s17 }
   0x7   :  { %p243_p0 = scmp.ne.s32.totalorder %s202_s17, %s242_s18  ;;  %p248_p2 = scmp.lt.s32.totalorder %s242_s18, %s242_s18 }
   0x9   :  { %p249_p3 = por %p248_p2, %p247_p1 }
   0xa   :  { %v165_v29 = vld [vmem:[#allocation2] sm:$0x1] }
   0xb   :  { %p250_p4 = pnand %p249_p3, %p243_p0 }
  0x83   :  { %v62_v6 = vpop.permute.xlu0 %61 }
  0x84   :  { %vm63_vm4 = vcmp.eq.s32.totalorder %v62_v6, %v59_v5 }
  0x85   :  { %v221_v7 = vsel %vm63_vm4, 1.0, %v267_v2 }
  0x86   :  { %230 = vmatmul.mubr.msk.f32.vlgmr.msra.gmra.mrb[0].mxu0 %vm66_vm3, %v221_v7 }
 0x159   :  { %v140_v9 = vpop.f32.mrb[0].mxu0 }
 0x15a   :  { %v144_v10 = vsub.f32 %v56_v8, %v140_v9  ;;  %v231_v11 = vpop.f32.mrb[1].mxu0 }
 0x15c   :  { %v145_v12 = vmul.f32 %v144_v10, %v144_v10 }
 0x15e   :  { %146 = vadd.xlane.f32.xlu0 %v145_v12 }
 0x1eb   :  { %v147_v13 = vpop.xlane.xlu0 %146 }
 0x1ec   :  { %240 = vrsqrt.f32 %v147_v13  ;;  %vm150_vm5 = vcmp.eq.f32.partialorder %v147_v13, inf  ;;  %v153_v16 = vand.u32 2147483648, %v147_v13  ;;  %vm152_vm6 = vcmp.eq.f32.partialorder %v147_v13, 0.0 }
 0x1f6   :  { %v241_v14 = vpop.eup %240 }
 0x1f7   :  { %v149_v15 = vmul.f32 %v241_v14, %v147_v13 }
 0x1f9   :  { %v151_v17 = vsel %vm150_vm5, %v147_v13, %v149_v15 }
 0x1fa   :  { %v154_v18 = vsel %vm152_vm6, %v153_v16, %v151_v17 }
 0x1fb   :  { %v155_v19 = vsub.f32 5.0, %v154_v18 }
 0x1fd   :  { %v156_v20 = vmax.f32 %v155_v19, 0.0 }
 0x1ff   :  { %v167_v21 = vsel %vm166_vm7, %v156_v20, 0.0 }
 0x200   :  { %168 = vadd.xlane.f32.xlu1 %v167_v21 }
 0x28d   :  { %v169_v22 = vpop.xlane.xlu1 %168 }
 0x28e   :  { %v170_v23 = vrot.slane %v169_v22, 4 }
 0x290   :  { %v171_v24 = vadd.f32 %v170_v23, %v169_v22 }
 0x292   :  { %v172_v25 = vrot.slane %v171_v24, 2 }
 0x294   :  { %v173_v26 = vadd.f32 %v172_v25, %v171_v24 }
 0x296   :  { %v174_v27 = vrot.slane %v173_v26, 1 }
 0x298   :  { %v175_v28 = vadd.f32 %v174_v27, %v173_v26 }
 0x29a   :  { %232 = vpush %v175_v28 }
 0x2cb   :  { %s233_s1 = spop %232 }
 0x2cc   :  { %v177_v30 = vstv %s233_s1 }
 0x2cd   :  { %v178_v31 = vadd.f32 %v177_v30, %v165_v29 }
 0x2cf   :  { %180 = vst.msk [vmem:[#allocation2] sm:$0x1] %vm53_vm0, %v178_v31 }
 0x2d6   :  { %v224_v32 = vld [vmem:[#allocation2] ss:$0 sm:$0xff] }
 0x2d7   :  { %191 = vperm.xlu1 %239, %v224_v32  }
 0x356   :  { %v192_v33 = vpop.permute.xlu1 %191 }
 0x357   :  { %194 = vst [vmem:[#allocation3] sm:$0xff] %v192_v33 }
 0x358   :  { %253 = shalt.err (!%p250_p4)
}
 0x359   :  { %s254_s21 = scalar_lea.hbm %s316_s3, 128 }
 0x35a   :  { %p255_p5 = scmp.ne.s32.totalorder %s316_s3, %s254_s21  ;;  %p258_p6 = scmp.lt.u32.totalorder %s254_s21, %s316_s3 }
 0x35c   :  { %p260_p7 = pnand %p258_p6, %p255_p5 }
 0x35e   :  { %263 = shalt.err (!%p260_p7)
}
 0x35f   :  { %204 = dma.vmem_to_hbm [thread:$0]  %s202_s17, 128, %s316_s3, [#allocation4]  }
 0x360   :  { %264 = dma.done.wait [#allocation4], 128  }
 0x361   :  { %265 = vsyncadd [#allocation4], 4294967168 }
 0x362   :  { %208 = vsyncpa [#allocation4], 1 }

</bundles_post_ra>
